<compile_context>
chip_gen: v7x
topology: tpu7x:2x2x1
jax: 0.10.0
libtpu: 0.0.40
codegen_flags: <defaults>
</compile_context>

<pallas_src>
import jax
import jax.numpy as jnp
from jax.experimental import pallas as pl
from jax.experimental.pallas import tpu as pltpu

BN_EPS = 1e-5
_VMEM_LIMIT = 32 * 1024 * 1024  # far above the ~2-4 MiB working set; fits v5e/v6e/v7x


def _pick_tile(total_rows, bytes_per_row, max_rows=1024, budget_bytes=2 * 1024 * 1024):
    """Largest row-tile that divides total_rows, is a multiple of 8 (sublane-aligned),
    respects a per-buffer VMEM byte budget and max_rows. Falls back to the full extent
    (a block equal to the array dim is always legal)."""
    cap = min(max_rows, max(8, budget_bytes // max(int(bytes_per_row), 1)))
    cap = min(cap, total_rows)
    for t in range(cap, 0, -1):
        if total_rows % t == 0 and (t % 8 == 0 or t == total_rows):
            return t
    return total_rows


def _conv_stats_kernel(xcol_ref, w_ref, conv_ref, stats_ref):
    """Pass 1: one MXU matmul per tile + per-channel partial sums for BatchNorm."""
    acc = jnp.dot(xcol_ref[...], w_ref[...], preferred_element_type=jnp.float32)
    conv_ref[...] = acc                                   # f32 intermediate (TR, C)
    row_sum = jnp.sum(acc, axis=0, keepdims=True)         # (1, C)
    row_sq = jnp.sum(acc * acc, axis=0, keepdims=True)    # (1, C)
    stats_ref[...] = jnp.concatenate([row_sum, row_sq], axis=0)   # (2, C)


def _bn_relu_kernel(conv_ref, s_ref, t_ref, out_ref):
    """Pass 2: fused scale/shift + ReLU in a single sweep (lane-dense layout)."""
    y = conv_ref[...] * s_ref[...] + t_ref[...]
    out_ref[...] = jnp.maximum(y, 0.0).astype(out_ref.dtype)


def circonv_forward(tgt, w, b, gamma, beta, n_adj=4,
                    compute_dtype=jnp.bfloat16, max_rows_per_tile=1024):
    """Pallas implementation of CirConv.forward.

    tgt   : (S0, S1, L, C) float32
    w     : (K, C, C) with w[k, ci, co] == torch_conv.weight[co, ci, k]
    b     : (C,) conv bias  -- mathematically absorbed by training-mode BatchNorm,
            kept in the signature for API fidelity but not used in the kernels.
    gamma : (C,) batchnorm weight
    beta  : (C,) batchnorm bias
    """
    del b  # exactly cancelled by training-mode BatchNorm (mean absorbs it)
    S0, S1, L, C = tgt.shape
    N = S0 * S1
    K = w.shape[0]
    assert K == 2 * n_adj + 1
    R = N * L

    # ---- wrapper glue: circular pad + im2col (pure layout work, done by XLA) ----
    x = tgt.reshape(N, L, C)
    xpad = jnp.concatenate([x[:, L - n_adj:, :], x, x[:, :n_adj, :]], axis=1)  # (N, L+2a, C)
    cols = jnp.stack([xpad[:, k:k + L, :] for k in range(K)], axis=2)          # (N, L, K, C)
    xcol = cols.reshape(R, K * C).astype(compute_dtype)
    wmat = w.reshape(K * C, C).astype(compute_dtype)

    # ---- pass 1: conv (single big-contraction matmul per tile) + BN partial sums ----
    in_bytes = jnp.dtype(compute_dtype).itemsize
    tr1 = _pick_tile(R, K * C * in_bytes + C * 4, max_rows=max_rows_per_tile)
    n_tiles = R // tr1

    conv, stats = pl.pallas_call(
        _conv_stats_kernel,
        out_shape=(
            jax.ShapeDtypeStruct((R, C), jnp.float32),           # conv intermediate
            jax.ShapeDtypeStruct((n_tiles, 2, C), jnp.float32),  # per-tile {sum, sumsq}
        ),
        grid=(n_tiles,),
        in_specs=[
            pl.BlockSpec((tr1, K * C), lambda i: (i, 0)),
            pl.BlockSpec((K * C, C), lambda i: (0, 0)),          # resident weight
        ],
        out_specs=(
            pl.BlockSpec((tr1, C), lambda i: (i, 0)),
            pl.BlockSpec((None, 2, C), lambda i: (i, 0, 0)),
        ),
        compiler_params=pltpu.CompilerParams(
            dimension_semantics=("parallel",),
            vmem_limit_bytes=_VMEM_LIMIT),
    )(xcol, wmat)

    # ---- tiny finalize in the wrapper: fold BN into a per-channel scale/shift ----
    tot = jnp.sum(stats, axis=0)                       # (2, C)
    mean = tot[0] / R
    var = jnp.maximum(tot[1] / R - mean * mean, 0.0)   # biased variance (training mode)
    inv = jax.lax.rsqrt(var + BN_EPS)
    s = gamma.astype(jnp.float32) * inv                # (C,)
    t = beta.astype(jnp.float32) - mean * s            # (C,)

    # ---- pass 2: fused affine + ReLU, lane-dense view when C < 128 ----
    if (C % 128 != 0) and (128 % C == 0) and ((R * C) % 128 == 0):
        rep = 128 // C
        R2, C2 = (R * C) // 128, 128
        conv2 = conv.reshape(R2, C2)                   # free: contiguous row-major view
        s2 = jnp.tile(s.reshape(1, C), (1, rep))
        t2 = jnp.tile(t.reshape(1, C), (1, rep))
    else:
        R2, C2 = R, C
        conv2 = conv
        s2 = s.reshape(1, C)
        t2 = t.reshape(1, C)

    out_bytes = jnp.dtype(tgt.dtype).itemsize
    tr2 = _pick_tile(R2, C2 * (4 + out_bytes), max_rows=max_rows_per_tile)

    out2 = pl.pallas_call(
        _bn_relu_kernel,
        out_shape=jax.ShapeDtypeStruct((R2, C2), tgt.dtype),
        grid=(R2 // tr2,),
        in_specs=[
            pl.BlockSpec((tr2, C2), lambda i: (i, 0)),
            pl.BlockSpec((1, C2), lambda i: (0, 0)),
            pl.BlockSpec((1, C2), lambda i: (0, 0)),
        ],
        out_specs=pl.BlockSpec((tr2, C2), lambda i: (i, 0)),
        compiler_params=pltpu.CompilerParams(
            dimension_semantics=("parallel",),
            vmem_limit_bytes=_VMEM_LIMIT),
    )(conv2, s2, t2)

    return out2.reshape(S0, S1, L, C)


def circonv_reference(tgt, w, b, gamma, beta, n_adj=4):
    """Pure-JAX reference mirroring the PyTorch module (training-mode batchnorm)."""
    S0, S1, L, C = tgt.shape
    x = tgt.reshape(S0 * S1, L, C).astype(jnp.float32)
    xpad = jnp.concatenate([x[:, L - n_adj:, :], x, x[:, :n_adj, :]], axis=1)
    K = w.shape[0]
    conv = jnp.zeros((S0 * S1, L, C), jnp.float32)
    for k in range(K):
        conv = conv + jnp.einsum("nlc,cd->nld", xpad[:, k:k + L, :], w[k])
    conv = conv + b[None, None, :]
    mean = jnp.mean(conv, axis=(0, 1), keepdims=True)
    var = jnp.mean((conv - mean) ** 2, axis=(0, 1), keepdims=True)
    y = (conv - mean) * jax.lax.rsqrt(var + BN_EPS)
    y = y * gamma[None, None, :] + beta[None, None, :]
    y = jnp.maximum(y, 0.0)
    return y.reshape(S0, S1, L, C)


if __name__ == "__main__":
    # Small shapes consistent with CirConv: tgt is 4-D with trailing dim d_model.
    S0, S1, L, d_model, n_adj = 2, 3, 32, 32, 4
    K = 2 * n_adj + 1

    key = jax.random.PRNGKey(0)
    k_in, k_w = jax.random.split(key)

    tgt = jax.random.normal(k_in, (S0, S1, L, d_model), dtype=jnp.float32)

    # Deterministic parameter init matching the module's __init__:
    #   conv.weight ~ N(0, 0.01), conv.bias = 0, bn.weight = 1, bn.bias = 0
    w = 0.01 * jax.random.normal(k_w, (K, d_model, d_model), dtype=jnp.float32)
    b = jnp.zeros((d_model,), jnp.float32)
    gamma = jnp.ones((d_model,), jnp.float32)
    beta = jnp.zeros((d_model,), jnp.float32)

    fwd = jax.jit(circonv_forward,
                  static_argnames=("n_adj", "compute_dtype", "max_rows_per_tile"))

    ref = circonv_reference(tgt, w, b, gamma, beta, n_adj=n_adj)

    # f32-matmul path: matches the f32 reference at tight tolerance.
    # max_rows_per_tile=32 forces a multi-tile grid (6 tiles pass 1, 2 tiles pass 2)
    # even at these tiny test shapes, exercising the pipelined path.
    out_f32 = jax.block_until_ready(
        fwd(tgt, w, b, gamma, beta, n_adj=n_adj,
            compute_dtype=jnp.float32, max_rows_per_tile=32))
    assert out_f32.shape == tgt.shape
    assert jnp.allclose(out_f32, ref, atol=1e-3, rtol=1e-3)

    # bf16-operand path (production default): looser tolerance for operand rounding.
    out_bf16 = jax.block_until_ready(
        fwd(tgt, w, b, gamma, beta, n_adj=n_adj,
            compute_dtype=jnp.bfloat16, max_rows_per_tile=32))
    assert jnp.allclose(out_bf16, ref, atol=2e-2, rtol=2e-2)

    print("KERNEL_OK")
</pallas_src>

<mosaic_0001>
module attributes {stable_mosaic.version = 11 : i64} {
  func.func @_conv_stats_kernel(%arg0: i32, %arg1: memref<32x288xf32, #tpu.memory_space<vmem>>, %arg2: memref<288x32xf32, #tpu.memory_space<vmem>>, %arg3: memref<32x32xf32, #tpu.memory_space<vmem>>, %arg4: memref<1x2x32xf32, #tpu.memory_space<vmem>>) attributes {dimension_semantics = [#tpu.dimension_semantics<parallel>], iteration_bounds = array<i64: 6>, scalar_prefetch = 0 : i64, scratch_operands = 0 : i64, tpu.core_type = #tpu.core_type<tc>, window_params = [{transform_indices = @transform_0, window_bounds = array<i64: 32, 288>}, {pipeline_mode = #tpu.pipeline_mode<synchronous>, transform_indices = @transform_1, window_bounds = array<i64: 288, 32>}, {transform_indices = @transform_2, window_bounds = array<i64: 32, 32>}, {transform_indices = @transform_3, window_bounds = array<i64: 1, 2, 32>}]} {
    %c0 = arith.constant 0 : index
    %c0_0 = arith.constant 0 : index
    %0 = vector.load %arg1[%c0, %c0_0] : memref<32x288xf32, #tpu.memory_space<vmem>>, vector<32x288xf32>
    %c0_1 = arith.constant 0 : index
    %c0_2 = arith.constant 0 : index
    %1 = vector.load %arg2[%c0_1, %c0_2] : memref<288x32xf32, #tpu.memory_space<vmem>>, vector<288x32xf32>
    %cst = arith.constant dense<0.000000e+00> : vector<32x32xf32>
    %2 = tpu.matmul %0, %1, %cst {dimension_numbers = #tpu.dot_dimension_numbers<[1], [0], [0], [1], [0, 0, 1, 1], [], []>} : vector<32x288xf32>, vector<288x32xf32>, vector<32x32xf32> -> vector<32x32xf32>
    %c0_3 = arith.constant 0 : index
    %c0_4 = arith.constant 0 : index
    %3 = vector.load %arg3[%c0_3, %c0_4] : memref<32x32xf32, #tpu.memory_space<vmem>>, vector<32x32xf32>
    tpu.vector_store %arg3[%c0_3, %c0_4], %2 {strides = array<i32>} : memref<32x32xf32, #tpu.memory_space<vmem>>, vector<32x32xf32>,
    %cst_5 = arith.constant dense<0.000000e+00> : vector<32xf32>
    %4 = vector.multi_reduction <add>, %2, %cst_5 [0] : vector<32x32xf32> to vector<32xf32>
    %5 = vector.shape_cast %4 : vector<32xf32> to vector<1x32xf32>
    %6 = arith.mulf %2, %2 : vector<32x32xf32>
    %cst_6 = arith.constant dense<0.000000e+00> : vector<32xf32>
    %7 = vector.multi_reduction <add>, %6, %cst_6 [0] : vector<32x32xf32> to vector<32xf32>
    %8 = vector.shape_cast %7 : vector<32xf32> to vector<1x32xf32>
    %9 = tpu.concatenate %5, %8 in 0 : vector<1x32xf32>, vector<1x32xf32> -> vector<2x32xf32>
    %c0_7 = arith.constant 0 : index
    %c0_8 = arith.constant 0 : index
    %c0_9 = arith.constant 0 : index
    %10 = vector.load %arg4[%c0_7, %c0_8, %c0_9] : memref<1x2x32xf32, #tpu.memory_space<vmem>>, vector<1x2x32xf32>
    %11 = vector.shape_cast %10 : vector<1x2x32xf32> to vector<2x32xf32>
    %12 = vector.shape_cast %9 : vector<2x32xf32> to vector<1x2x32xf32>
    tpu.vector_store %arg4[%c0_7, %c0_8, %c0_9], %12 {strides = array<i32>} : memref<1x2x32xf32, #tpu.memory_space<vmem>>, vector<1x2x32xf32>,
    return
  }
  func.func @transform_0(%arg0: i32) -> (i32, i32) {
    %c0_i32 = arith.constant 0 : i32
    %c0_i32_0 = arith.constant 0 : i32
    return %arg0, %c0_i32 : i32, i32
  }
  func.func @transform_1(%arg0: i32) -> (i32, i32) {
    %c0_i32 = arith.constant 0 : i32
    %c0_i32_0 = arith.constant 0 : i32
    %c0_i32_1 = arith.constant 0 : i32
    return %c0_i32, %c0_i32_0 : i32, i32
  }
  func.func @transform_2(%arg0: i32) -> (i32, i32) {
    %c0_i32 = arith.constant 0 : i32
    %c0_i32_0 = arith.constant 0 : i32
    return %arg0, %c0_i32 : i32, i32
  }
  func.func @transform_3(%arg0: i32) -> (i32, i32, i32) {
    %c0_i32 = arith.constant 0 : i32
    %c0_i32_0 = arith.constant 0 : i32
    %c0_i32_1 = arith.constant 0 : i32
    return %arg0, %c0_i32, %c0_i32_0 : i32, i32, i32
  }
}

module attributes {stable_mosaic.version = 11 : i64} {
  func.func @_bn_relu_kernel(%arg0: i32, %arg1: memref<24x128xf32, #tpu.memory_space<vmem>>, %arg2: memref<1x128xf32, #tpu.memory_space<vmem>>, %arg3: memref<1x128xf32, #tpu.memory_space<vmem>>, %arg4: memref<24x128xf32, #tpu.memory_space<vmem>>) attributes {dimension_semantics = [#tpu.dimension_semantics<parallel>], iteration_bounds = array<i64: 2>, scalar_prefetch = 0 : i64, scratch_operands = 0 : i64, tpu.core_type = #tpu.core_type<tc>, window_params = [{transform_indices = @transform_0, window_bounds = array<i64: 24, 128>}, {pipeline_mode = #tpu.pipeline_mode<synchronous>, transform_indices = @transform_1, window_bounds = array<i64: 1, 128>}, {pipeline_mode = #tpu.pipeline_mode<synchronous>, transform_indices = @transform_2, window_bounds = array<i64: 1, 128>}, {transform_indices = @transform_3, window_bounds = array<i64: 24, 128>}]} {
    %c0 = arith.constant 0 : index
    %c0_0 = arith.constant 0 : index
    %0 = vector.load %arg1[%c0, %c0_0] : memref<24x128xf32, #tpu.memory_space<vmem>>, vector<24x128xf32>
    %c0_1 = arith.constant 0 : index
    %c0_2 = arith.constant 0 : index
    %1 = vector.load %arg2[%c0_1, %c0_2] : memref<1x128xf32, #tpu.memory_space<vmem>>, vector<1x128xf32>
    %2 = vector.broadcast %1 : vector<1x128xf32> to vector<24x128xf32>
    %3 = arith.mulf %0, %2 : vector<24x128xf32>
    %c0_3 = arith.constant 0 : index
    %c0_4 = arith.constant 0 : index
    %4 = vector.load %arg3[%c0_3, %c0_4] : memref<1x128xf32, #tpu.memory_space<vmem>>, vector<1x128xf32>
    %5 = vector.broadcast %4 : vector<1x128xf32> to vector<24x128xf32>
    %6 = arith.addf %3, %5 : vector<24x128xf32>
    %cst = arith.constant 0.000000e+00 : f32
    %7 = vector.broadcast %cst : f32 to vector<24x128xf32>
    %8 = arith.maximumf %6, %7 : vector<24x128xf32>
    %c0_5 = arith.constant 0 : index
    %c0_6 = arith.constant 0 : index
    %9 = vector.load %arg4[%c0_5, %c0_6] : memref<24x128xf32, #tpu.memory_space<vmem>>, vector<24x128xf32>
    tpu.vector_store %arg4[%c0_5, %c0_6], %8 {strides = array<i32>} : memref<24x128xf32, #tpu.memory_space<vmem>>, vector<24x128xf32>,
    return
  }
  func.func @transform_0(%arg0: i32) -> (i32, i32) {
    %c0_i32 = arith.constant 0 : i32
    %c0_i32_0 = arith.constant 0 : i32
    return %arg0, %c0_i32 : i32, i32
  }
  func.func @transform_1(%arg0: i32) -> (i32, i32) {
    %c0_i32 = arith.constant 0 : i32
    %c0_i32_0 = arith.constant 0 : i32
    %c0_i32_1 = arith.constant 0 : i32
    return %c0_i32, %c0_i32_0 : i32, i32
  }
  func.func @transform_2(%arg0: i32) -> (i32, i32) {
    %c0_i32 = arith.constant 0 : i32
    %c0_i32_0 = arith.constant 0 : i32
    %c0_i32_1 = arith.constant 0 : i32
    return %c0_i32, %c0_i32_0 : i32, i32
  }
  func.func @transform_3(%arg0: i32) -> (i32, i32) {
    %c0_i32 = arith.constant 0 : i32
    %c0_i32_0 = arith.constant 0 : i32
    return %arg0, %c0_i32 : i32, i32
  }
}

</mosaic_0001>

<bundles_post_ra>
// kernel: circonv_forward.3
= control target key start
LH: loop header
LB: loop body
LE: loop exit
PB: predicated region body
PF: predicated region fallthrough
CT: control target
= control target key end

     0   :  { %s306_s12 = smov 0   ;;  %s329_s0 = inlined_call_operand.vmem [shape: f32[48,128], index: 0, kind: input, shape index: {}]   ;;  %s330_s1 = inlined_call_operand.vmem [shape: f32[1,128], index: 1, kind: input, shape index: {}]   ;;  %s331_s2 = inlined_call_operand.vmem [shape: f32[1,128], index: 2, kind: input, shape index: {}]   ;;  %s332_s3 = inlined_call_operand.vmem [shape: f32[48,128], index: 3, kind: output, shape index: {}]  }
   0x1 LB: > { %s259_s13 = sadd.s32 4294967295, %s284_s12   ;;  %p263_p0 = scmp.ge.s32.totalorder %s284_s12, 1  ;;  %s284_s12 = sphi %s306_s12, %s13_s12  }
   0x2   : > { %p138_p1 = scmp.lt.s32.totalorder %s284_s12, 3 }
   0x4   : > { %p139_p2 = pnand %p263_p0, %p138_p1 }
   0x5   : > { %s162_s14 = smul.u32 (!%p139_p2), 3, %s259_s13  ;;  %v266_v0 = vld [vmem:[%s330_s1] ss:$0 sm:$0xff] (!%p139_p2) }
   0x6   : > { %142 = sbr.rel (%p139_p2) target bundleno = 25 (0x19), region = 32  ;;  %v267_v1 = vld [vmem:[%s331_s2] ss:$0 sm:$0xff] (!%p139_p2) }
   0x7   : > { %p163_p3 = scmp.lt.s32.totalorder (!%p139_p2), %s162_s14, 5 }
   0xd   : > { %s334_s14 = smov (!%p163_p3, %s162_s14), 5 }
   0xe   : > { %s264_s15 = sshll.u32 %s334_s14, 3 }
   0xf   : > { %s166_s20 = scalar_lea.vmem %s329_s0, %s264_s15  ;;  %s172_s25 = scalar_lea.vmem %s332_s3, %s264_s15 }
  0x10   : > { %v174_v2 = vld [vmem:[%s166_s20] sm:$0xff]  ;;  %v175_v3 = vld [vmem:[%s166_s20 + $0x8] sm:$0xff]  ;;  %v176_v4 = vld [vmem:[%s166_s20 + $0x10] sm:$0xff] }
  0x11   : > { %v184_v5 = vmul.f32 %v266_v0, %v174_v2  ;;  %v185_v6 = vmul.f32 %v266_v0, %v175_v3  ;;  %v186_v7 = vmul.f32 %v266_v0, %v176_v4 }
  0x13   : > { %v194_v8 = vadd.f32 %v267_v1, %v184_v5  ;;  %v195_v9 = vadd.f32 %v267_v1, %v185_v6  ;;  %v196_v10 = vadd.f32 %v267_v1, %v186_v7 }
  0x15   : > { %v197_v11 = vmax.f32 %v194_v8, 0.0  ;;  %v198_v12 = vmax.f32 %v195_v9, 0.0  ;;  %v199_v13 = vmax.f32 %v196_v10, 0.0 }
  0x17   : > { %200 = vst [vmem:[%s172_s25] sm:$0xff] %v197_v11  ;;  %201 = vst [vmem:[%s172_s25 + $0x8] sm:$0xff] %v198_v12 }
  0x18   : > { %202 = vst [vmem:[%s172_s25 + $0x10] sm:$0xff] %v199_v13 }
  0x19 PF: > { %s13_s12 = sadd.s32 1, %s284_s12  }
  0x1a   : > { %p10_p4 = scmp.ge.s32.totalorder %s13_s12, 4  }
  0x1c   :  { %12 = sbr.rel (!%p10_p4) target bundleno = 1 (0x1), region = 62 }

// kernel: circonv_forward.2
= control target key start
LH: loop header
LB: loop body
LE: loop exit
PB: predicated region body
PF: predicated region fallthrough
CT: control target
= control target key end

     0   :  { %s703_s12 = smov 0   ;;  %s870_s0 = inlined_call_operand.vmem [shape: f32[192,288], index: 0, kind: input, shape index: {}]   ;;  %s871_s1 = inlined_call_operand.vmem [shape: f32[288,32], index: 1, kind: input, shape index: {}]   ;;  %s872_s2 = inlined_call_operand.vmem [shape: f32[192,32], index: 2, kind: output, shape index: {0}]   ;;  %s873_s3 = inlined_call_operand.vmem [shape: f32[6,2,32], index: 3, kind: output, shape index: {1}]  }
   0x1 LB: > { %s709_s13 = sadd.s32 4294967295, %s681_s12   ;;  %p548_p0 = scmp.ge.s32.totalorder %s681_s12, 1  ;;  %s681_s12 = sphi %s703_s12, %s14_s12  }
   0x2   : > { %p142_p1 = scmp.lt.s32.totalorder %s681_s12, 7 }
   0x4   : > { %p143_p2 = pnand %p548_p0, %p142_p1 }
   0x5   : > { %v216_v0 = vld [vmem:[%s871_s1 + $0x80] sm:$0xff] (!%p143_p2)  ;;  %v217_v1 = vld [vmem:[%s871_s1 + $0x88] sm:$0xff] (!%p143_p2)  ;;  %s549_s20 = sshll.u32 (!%p143_p2), %s709_s13, 2  ;;  %v218_v5 = vld [vmem:[%s871_s1 + $0x90] sm:$0xff] (!%p143_p2)  ;;  %vm236_vm0 = vcmask (!%p143_p2), 261120   ;;  %p184_p4 = scmp.lt.s32.totalorder (!%p143_p2), %s709_s13, 5 }
   0x6   : > { %146 = sbr.rel (%p143_p2) target bundleno = 288 (0x120), region = 28  ;;  %v200_v2 = vld [vmem:[%s871_s1] sm:$0xff] (!%p143_p2)  ;;  %v626_v3 = vpack.c.bf16 (!%p143_p2), %v217_v1, %v216_v0  ;;  %v201_v4 = vld [vmem:[%s871_s1 + $0x8] sm:$0xff] (!%p143_p2)  ;;  %v219_v6 = vld [vmem:[%s871_s1 + $0x98] sm:$0xff] (!%p143_p2)  ;;  %p172_p3 = scmp.lt.s32.totalorder (!%p143_p2), %s549_s20, 23  ;;  %vm453_vm1 = vcmask (!%p143_p2), 1040384  }
   0x7   : > { %v628_v7 = vpack.c.bf16 (!%p143_p2), %v201_v4, %v200_v2  ;;  %v630_v8 = vpack.c.bf16 (!%p143_p2), %v219_v6, %v218_v5  ;;  %v202_v9 = vld [vmem:[%s871_s1 + $0x10] sm:$0xff] (!%p143_p2)  ;;  %v203_v10 = vld [vmem:[%s871_s1 + $0x18] sm:$0xff] (!%p143_p2)  ;;  %v220_v11 = vld [vmem:[%s871_s1 + $0xa0] sm:$0xff] (!%p143_p2)  ;;  %vm455_vm2 = vcmask (!%p143_p2), 254976  }
   0x8   : > { %627 = vmatprep.subr.bf16.mxu0 (!%p143_p2), %v626_v3  ;;  %v221_v12 = vld [vmem:[%s871_s1 + $0xa8] sm:$0xff] (!%p143_p2)  ;;  %v632_v13 = vpack.c.bf16 (!%p143_p2), %v203_v10, %v202_v9  ;;  %v204_v15 = vld [vmem:[%s871_s1 + $0x20] sm:$0xff] (!%p143_p2)  ;;  %v222_v17 = vld [vmem:[%s871_s1 + $0xb0] sm:$0xff] (!%p143_p2) }
   0x9   : > { %629 = vmatpush3.bf16.msra.mxu0 (!%p143_p2), %v628_v7  ;;  %v634_v14 = vpack.c.bf16 (!%p143_p2), %v221_v12, %v220_v11  ;;  %v205_v16 = vld [vmem:[%s871_s1 + $0x28] sm:$0xff] (!%p143_p2)  ;;  %v223_v18 = vld [vmem:[%s871_s1 + $0xb8] sm:$0xff] (!%p143_p2)  ;;  %v206_v20 = vld [vmem:[%s871_s1 + $0x30] sm:$0xff] (!%p143_p2) }
   0xa   : > { %631 = vmatprep.subr.bf16.mxu0 (!%p143_p2), %v630_v8  ;;  %v636_v19 = vpack.c.bf16 (!%p143_p2), %v205_v16, %v204_v15  ;;  %v638_v21 = vpack.c.bf16 (!%p143_p2), %v223_v18, %v222_v17  ;;  %v207_v22 = vld [vmem:[%s871_s1 + $0x38] sm:$0xff] (!%p143_p2)  ;;  %v232_v23 = vld [vmem:[%s871_s1 + $0x100] sm:$0xff] (!%p143_p2)  ;;  %v233_v24 = vld [vmem:[%s871_s1 + $0x108] sm:$0xff] (!%p143_p2) }
   0xb   : > { %v224_v25 = vld [vmem:[%s871_s1 + $0xc0] sm:$0xff] (!%p143_p2)  ;;  %v225_v26 = vld [vmem:[%s871_s1 + $0xc8] sm:$0xff] (!%p143_p2)  ;;  %v658_v27 = vpack.c.bf16 (!%p143_p2), %v233_v24, %v232_v23  ;;  %v234_v28 = vld [vmem:[%s871_s1 + $0x110] sm:$0xff] (!%p143_p2)  ;;  %v640_v30 = vpack.c.bf16 (!%p143_p2), %v207_v22, %v206_v20 }
   0xc   : > { %v235_v29 = vld [vmem:[%s871_s1 + $0x118] sm:$0xff] (!%p143_p2)  ;;  %v642_v34 = vpack.c.bf16 (!%p143_p2), %v225_v26, %v224_v25  ;;  %v208_v35 = vld [vmem:[%s871_s1 + $0x40] sm:$0xff] (!%p143_p2)  ;;  %v209_v36 = vld [vmem:[%s871_s1 + $0x48] sm:$0xff] (!%p143_p2) }
   0xd   : > { %s875_s20 = smov (!%p172_p3, %s549_s20), 23  ;;  %633 = vmatpush3.bf16.msra.mxu0 %v632_v13  ;;  %659 = vmatprep.subr.bf16.mxu1 %v658_v27  ;;  %v662_v31 = vpack.c.bf16 %v235_v29, %v234_v28  ;;  %v226_v37 = vld [vmem:[%s871_s1 + $0xd0] sm:$0xff]  ;;  %v227_v38 = vld [vmem:[%s871_s1 + $0xd8] sm:$0xff]  ;;  %v644_v39 = vpack.c.bf16 %v209_v36, %v208_v35  ;;  %v228_v44 = vld [vmem:[%s871_s1 + $0xe0] sm:$0xff]  ;;  %s877_s13 = smov (!%p184_p4, %s709_s13), 5 }
   0xe   : > { %s666_s14 = smul.u32 24, %s875_s20  ;;  %635 = vmatprep.subr.bf16.mxu0 %v634_v14  ;;  %661 = vmatpush3.bf16.msra.mxu1 %v658_v27  ;;  %v646_v40 = vpack.c.bf16 %v227_v38, %v226_v37  ;;  %v210_v41 = vld [vmem:[%s871_s1 + $0x50] sm:$0xff]  ;;  %v211_v42 = vld [vmem:[%s871_s1 + $0x58] sm:$0xff]  ;;  %v229_v45 = vld [vmem:[%s871_s1 + $0xe8] sm:$0xff]  ;;  %s552_s19 = sshll.u32 %s875_s20, 3 }
   0xf   : > { %663 = vmatprep.subr.bf16.mxu1 %v662_v31  ;;  %v648_v47 = vpack.c.bf16 %v211_v42, %v210_v41  ;;  %v650_v48 = vpack.c.bf16 %v229_v45, %v228_v44  ;;  %v212_v49 = vld [vmem:[%s871_s1 + $0x60] sm:$0xff]  ;;  %v213_v50 = vld [vmem:[%s871_s1 + $0x68] sm:$0xff]  ;;  %v230_v52 = vld [vmem:[%s871_s1 + $0xf0] sm:$0xff]  ;;  %s182_s23 = scalar_lea.vmem %s872_s2, %s552_s19  ;;  %s553_s20 = sshll.u32 %s877_s13, 1 }
  0x10   : > { %s774_s30 = scalar_lea.vmem %s870_s0, %s666_s14  ;;  %v231_v53 = vld [vmem:[%s871_s1 + $0xf8] sm:$0xff]  ;;  %v652_v54 = vpack.c.bf16 %v213_v50, %v212_v49  ;;  %v214_v56 = vld [vmem:[%s871_s1 + $0x70] sm:$0xff]  ;;  %s187_s25 = scalar_lea.vmem %s873_s3, %s553_s20 }
  0x11   : > { %637 = vmatpush3.bf16.msra.mxu0 %v636_v19  ;;  %v189_v32 = vld [vmem:[%s774_s30 + $0x8] sm:$0xff]  ;;  %v190_v33 = vld [vmem:[%s774_s30 + $0x10] sm:$0xff]  ;;  %v196_v46 = vld [vmem:[%s774_s30 + $0x40] sm:$0xff]  ;;  %v654_v55 = vpack.c.bf16 %v231_v53, %v230_v52 }
  0x12   : > { %639 = vmatprep.subr.bf16.mxu0 %v638_v21  ;;  %313 = vmatprep.mubr.f32.mxu0 %v189_v32  ;;  %v193_v43 = vld [vmem:[%s774_s30 + $0x28] sm:$0xff]  ;;  %v199_v51 = vld [vmem:[%s774_s30 + $0x58] sm:$0xff]  ;;  %v188_v59 = vld [vmem:[%s774_s30] sm:$0xff] }
  0x13   : > { %620 = vmatprep.mubr.msk.f32.mxu1 %vm236_vm0, %v190_v33  ;;  %665 = vmatpush3.bf16.msra.mxu1 %v662_v31  ;;  %v215_v57 = vld [vmem:[%s871_s1 + $0x78] sm:$0xff]  ;;  %v192_v60 = vld [vmem:[%s774_s30 + $0x20] sm:$0xff]  ;;  %v194_v63 = vld [vmem:[%s774_s30 + $0x30] sm:$0xff] }
  0x14   : > { %v656_v58 = vpack.c.bf16 %v215_v57, %v214_v56  ;;  %v191_v61 = vld [vmem:[%s774_s30 + $0x18] sm:$0xff]  ;;  %v198_v0 = vld [vmem:[%s774_s30 + $0x50] sm:$0xff]  ;;  %v197_v1 = vld [vmem:[%s774_s30 + $0x48] sm:$0xff] }
  0x15   : > { %641 = vmatpush3.bf16.msra.mxu0 %v640_v30  ;;  %v195_v62 = vld [vmem:[%s774_s30 + $0x38] sm:$0xff] }
  0x16   : > { %643 = vmatprep.subr.bf16.mxu0 %v642_v34  ;;  %621 = vmatmul.mubr.msk.f32.vlgmr.msra.gmra.mrb[0].mxu1 %vm236_vm0, %v193_v43 }
  0x17   : > { %623 = vmatprep.mubr.msk.f32.mxu1 %vm236_vm0, %v196_v46 }
  0x19   : > { %645 = vmatpush3.bf16.msra.mxu0 %v644_v39 }
  0x1a   : > { %647 = vmatprep.subr.bf16.mxu0 %v646_v40  ;;  %624 = vmatmul.mubr.msk.f32.gmra.mrb[2].mxu1 %vm236_vm0, %v199_v51 }
  0x1d   : > { %649 = vmatpush3.bf16.msra.mxu0 %v648_v47 }
  0x1e   : > { %651 = vmatprep.subr.bf16.mxu0 %v650_v48 }
  0x21   : > { %653 = vmatpush3.bf16.msra.mxu0 %v652_v54 }
  0x22   : > { %655 = vmatprep.subr.bf16.mxu0 %v654_v55 }
  0x25   : > { %657 = vmatpush3.bf16.msra.mxu0 %v656_v58 }
  0x28   : > { %314 = vmatmul.mubr.f32.vlgmr.msra.gmra.mrb[0].mxu0 %v188_v59 }
  0x29   : > { %318 = vmatprep.mubr.f32.mxu0 %v192_v60 }
  0x2c   : > { %319 = vmatmul.mubr.f32.gmra.mrb[2].mxu0 %v191_v61 }
  0x2d   : > { %323 = vmatprep.mubr.f32.mxu0 %v195_v62 }
  0x30   : > { %324 = vmatmul.mubr.f32.gmra.mrb[4].mxu0 %v194_v63 }
  0x31   : > { %328 = vmatprep.mubr.f32.mxu0 %v198_v0 }
  0x34   : > { %329 = vmatmul.mubr.f32.gmra.mrb[6].mxu0 %v197_v1 }
  0xe9   : > { %v622_v2 = vpop.f32.mrb[0].mxu1 }
  0xea   : > { %v400_v3 = vpop.f32.mrb[1].mxu1 }
  0xed   : > { %v625_v4 = vpop.f32.mrb[2].mxu1 }
  0xee   : > { %v410_v5 = vpop.f32.mrb[3].mxu1 }
  0xfb   : > { %v592_v6 = vpop.f32.mrb[0].mxu0 }
  0xfc   : > { %v593_v7 = vpop.f32.mrb[1].mxu0 }
  0xfd   : > { %v594_v8 = vadd.f32 %v593_v7, %v592_v6 }
  0xff   : > { %v401_v9 = vadd.f32 %v594_v8, %v400_v3  ;;  %v595_v10 = vpop.f32.mrb[2].mxu0 }
 0x100   : > { %v596_v11 = vpop.f32.mrb[3].mxu0 }
 0x101   : > { %419 = vst.msk [vmem:[%s182_s23] sm:$0xff] %vm236_vm0, %v401_v9  ;;  %v597_v12 = vadd.f32 %v596_v11, %v595_v10  ;;  %v436_v13 = vmul.f32 %v401_v9, %v401_v9  ;;  %v423_v17 = vsel %vm236_vm0, %v401_v9, 0.0 }
 0x103   : > { %v406_v14 = vadd.f32 %v622_v2, %v597_v12  ;;  %v598_v15 = vpop.f32.mrb[4].mxu0  ;;  %v440_v22 = vsel %vm236_vm0, %v436_v13, 0.0 }
 0x104   : > { %v599_v16 = vpop.f32.mrb[5].mxu0 }
 0x105   : > { %420 = vst.msk [vmem:[%s182_s23 + $0x8] sm:$0xff] %vm236_vm0, %v406_v14  ;;  %v424_v18 = vsel %vm236_vm0, %v406_v14, 0.0  ;;  %v437_v19 = vmul.f32 %v406_v14, %v406_v14  ;;  %v600_v20 = vadd.f32 %v599_v16, %v598_v15 }
 0x106   : > { %v425_v21 = vadd.f32 %v424_v18, %v423_v17 }
 0x107   : > { %v441_v23 = vsel %vm236_vm0, %v437_v19, 0.0  ;;  %v411_v24 = vadd.f32 %v600_v20, %v410_v5  ;;  %v601_v25 = vpop.f32.mrb[6].mxu0 }
 0x108   : > { %v442_v26 = vadd.f32 %v441_v23, %v440_v22  ;;  %v602_v27 = vpop.f32.mrb[7].mxu0 }
 0x109   : > { %421 = vst.msk [vmem:[%s182_s23 + $0x10] sm:$0xff] %vm236_vm0, %v411_v24  ;;  %v426_v28 = vsel %vm236_vm0, %v411_v24, 0.0  ;;  %v438_v29 = vmul.f32 %v411_v24, %v411_v24  ;;  %v603_v30 = vadd.f32 %v602_v27, %v601_v25 }
 0x10a   : > { %v427_v31 = vadd.f32 %v426_v28, %v425_v21 }
 0x10b   : > { %v443_v32 = vsel %vm236_vm0, %v438_v29, 0.0  ;;  %v416_v33 = vadd.f32 %v625_v4, %v603_v30 }
 0x10c   : > { %v444_v34 = vadd.f32 %v443_v32, %v442_v26 }
 0x10d   : > { %422 = vst.msk [vmem:[%s182_s23 + $0x18] sm:$0xff] %vm236_vm0, %v416_v33  ;;  %v428_v35 = vsel %vm236_vm0, %v416_v33, 0.0  ;;  %v439_v36 = vmul.f32 %v416_v33, %v416_v33 }
 0x10e   : > { %v429_v37 = vadd.f32 %v428_v35, %v427_v31 }
 0x10f   : > { %v445_v38 = vsel %vm236_vm0, %v439_v36, 0.0 }
 0x110   : > { %v430_v39 = vrot.slane %v429_v37, 4  ;;  %v446_v40 = vadd.f32 %v445_v38, %v444_v34 }
 0x112   : > { %v431_v41 = vadd.f32 %v430_v39, %v429_v37  ;;  %v447_v42 = vrot.slane %v446_v40, 4 }
 0x114   : > { %v432_v43 = vrot.slane %v431_v41, 2  ;;  %v448_v44 = vadd.f32 %v447_v42, %v446_v40 }
 0x116   : > { %v433_v45 = vadd.f32 %v432_v43, %v431_v41  ;;  %v449_v46 = vrot.slane %v448_v44, 2 }
 0x118   : > { %v434_v47 = vrot.slane %v433_v45, 1  ;;  %v450_v48 = vadd.f32 %v449_v46, %v448_v44 }
 0x11a   : > { %v451_v49 = vrot.slane %v450_v48, 1  ;;  %v435_v50 = vadd.f32 %v434_v47, %v433_v45 }
 0x11c   : > { %v452_v51 = vadd.f32 %v451_v49, %v450_v48 }
 0x11e   : > { %v454_v52 = vsel %vm453_vm1, %v435_v50, %v452_v51 }
 0x11f   : > { %456 = vst.msk [vmem:[%s187_s25] sm:$0x3] %vm455_vm2, %v454_v52 }
 0x120 PF: > { %s14_s12 = sadd.s32 1, %s681_s12  }
 0x121   : > { %p11_p5 = scmp.ge.s32.totalorder %s14_s12, 8  }
 0x123   :  { %13 = sbr.rel (!%p11_p5) target bundleno = 1 (0x1), region = 70 }

</bundles_post_ra>
